<compile_context>
chip_gen: v5e
topology: v5e:2x2
jax: 0.10.0
libtpu: 0.0.40
codegen_flags: <defaults>
</compile_context>

<pallas_src>
import functools

import jax
import jax.numpy as jnp
from jax.experimental import pallas as pl
from jax.experimental.pallas import tpu as pltpu

_LANE = 128
_BN_EPS = 1e-5


def _softplus(x):
    # numerically stable softplus without a compare+select pair
    return jnp.maximum(x, 0.0) + jnp.log1p(jnp.exp(-jnp.abs(x)))


def _encoder_kernel(total_rows,
                    x_ref, w0_ref, b0_ref, w1_ref, w2_ref, b2_ref,
                    out_ref, h_buf, sum_ref, sumsq_ref):
    phase = pl.program_id(0)
    b = pl.program_id(1)
    tb = x_ref.shape[0]

    row0 = b * tb
    if tb % 8 == 0:
        row0 = pl.multiple_of(row0, tb)

    @pl.when(jnp.logical_and(phase == 0, b == 0))
    def _init():
        sum_ref[...] = jnp.zeros_like(sum_ref)
        sumsq_ref[...] = jnp.zeros_like(sumsq_ref)

    @pl.when(phase == 0)
    def _phase0():
        # layer_in (Linear) + outer softplus
        h = _softplus(jnp.dot(x_ref[...], w0_ref[...],
                              preferred_element_type=jnp.float32) + b0_ref[...])
        # hidden Linear.  b1 is dropped: BatchNorm subtracts the batch mean, so
        # the pre-BN bias cancels exactly.
        h1 = jnp.dot(h, w1_ref[...], preferred_element_type=jnp.float32)
        h_buf[pl.ds(row0, tb), :] = h1
        sum_ref[...] += jnp.sum(h1, axis=0, keepdims=True)
        sumsq_ref[...] += jnp.sum(h1 * h1, axis=0, keepdims=True)

    @pl.when(phase == 1)
    def _phase1():
        inv_n = 1.0 / float(total_rows)
        mean = sum_ref[...] * inv_n
        var = sumsq_ref[...] * inv_n - mean * mean          # biased variance
        inv_std = jax.lax.rsqrt(var + _BN_EPS)              # gamma=1, beta=0 folded away
        h1 = h_buf[pl.ds(row0, tb), :]
        h = _softplus(_softplus((h1 - mean) * inv_std))     # Sequential softplus + outer softplus
        out_ref[...] = (jnp.dot(h, w2_ref[...],
                                preferred_element_type=jnp.float32) + b2_ref[...])


def _pick_tile(batch, max_tile=256):
    for tb in (max_tile, 128, 64, 32, 16, 8):
        if tb <= batch and batch % tb == 0:
            return tb
    return batch   # single full-batch tile (always a legal block shape)


def categorical_encoder(x, params, *, block_rows=None):
    w0, b0, w1, b1, gamma, beta, w2, b2 = params
    del b1          # shift before BatchNorm has no effect on the output
    del gamma, beta  # BatchNorm1d defaults (1, 0) at init -> identity affine

    B, in_features = x.shape
    h0 = w0.shape[1]
    h1 = w1.shape[1]
    out_features = w2.shape[1]

    # Lane-dense output: pad the last layer to a multiple of 128 columns so the
    # final store is an unmasked full-lane vst; slice back in the wrapper.
    n_pad = pl.cdiv(out_features, _LANE) * _LANE
    w2p = jnp.zeros((h1, n_pad), jnp.float32).at[:, :out_features].set(w2)
    b2p = jnp.zeros((1, n_pad), jnp.float32).at[:, :out_features].set(b2)

    if block_rows is None:
        tb = _pick_tile(B)
    else:
        assert B % block_rows == 0 and (block_rows % 8 == 0 or block_rows == B)
        tb = block_rows
    nb = B // tb
    grid = (2, nb)   # (phase, batch tile)

    # Whole-batch pre-BN activations stay VMEM-resident; keep well below the
    # scoped VMEM budget (v7x has only 64 MiB of physical VMEM).
    assert B * h1 * 4 <= 24 * 1024 * 1024, "h_buf would blow the VMEM budget"

    def resident(shape):
        nd = len(shape)
        return pl.BlockSpec(shape, lambda p, b, _nd=nd: (0,) * _nd)

    flops = 2 * B * (in_features * h0 + h0 * h1 + h1 * n_pad)
    transcendentals = 2 * B * (h0 + 2 * h1)       # exp + log1p per softplus
    bytes_accessed = 4 * (x.size + w0.size + b0.size + w1.size
                          + w2p.size + b2p.size + B * n_pad)

    out = pl.pallas_call(
        functools.partial(_encoder_kernel, B),
        out_shape=jax.ShapeDtypeStruct((B, n_pad), jnp.float32),
        grid=grid,
        in_specs=[
            pl.BlockSpec((tb, in_features), lambda p, b: (b, 0)),  # x, batch-tiled
            resident(w0.shape),       # weights stay VMEM-resident across steps
            resident(b0.shape),
            resident(w1.shape),
            resident(w2p.shape),
            resident(b2p.shape),
        ],
        out_specs=pl.BlockSpec((tb, n_pad), lambda p, b: (b, 0)),
        scratch_shapes=[
            pltpu.VMEM((B, h1), jnp.float32),   # pre-BN activations, whole batch
            pltpu.VMEM((1, h1), jnp.float32),   # running per-feature sum
            pltpu.VMEM((1, h1), jnp.float32),   # running per-feature sum of squares
        ],
        # Both axes sequential: phase 1 consumes whole-batch BN statistics that
        # phase 0 accumulates in a single per-core scratch.
        compiler_params=pltpu.CompilerParams(
            dimension_semantics=("arbitrary", "arbitrary")),
        cost_estimate=pl.CostEstimate(
            flops=int(flops),
            transcendentals=int(transcendentals),
            bytes_accessed=int(bytes_accessed)),
    )(x, w0, b0, w1, w2p, b2p)

    return out[:, :out_features]


def _xavier_uniform(key, fan_in, fan_out):
    limit = (6.0 / (fan_in + fan_out)) ** 0.5
    # stored as (in, out) = transpose of PyTorch (out, in); limit symmetric in fans
    return jax.random.uniform(key, (fan_in, fan_out), jnp.float32, -limit, limit)


def make_params(key, input_size, hidden_sizes, output_size):
    h0, h1 = hidden_sizes
    ks = jax.random.split(key, 6)
    w0 = _xavier_uniform(ks[0], input_size, h0)
    b0 = 0.001 * jax.random.normal(ks[1], (1, h0), jnp.float32)
    w1 = _xavier_uniform(ks[2], h0, h1)
    b1 = 0.001 * jax.random.normal(ks[3], (1, h1), jnp.float32)
    gamma = jnp.ones((1, h1), jnp.float32)   # BatchNorm1d default weight
    beta = jnp.zeros((1, h1), jnp.float32)   # BatchNorm1d default bias
    w2 = _xavier_uniform(ks[4], h1, output_size)
    b2 = 0.001 * jax.random.normal(ks[5], (1, output_size), jnp.float32)
    return (w0, b0, w1, b1, gamma, beta, w2, b2)


def reference(x, params):
    # Pure-JAX reference that keeps b1 / gamma / beta, proving the kernel's
    # algebraic simplifications preserve the forward pass.
    w0, b0, w1, b1, gamma, beta, w2, b2 = params
    h = _softplus(x @ w0 + b0)
    h = h @ w1 + b1
    mean = jnp.mean(h, axis=0, keepdims=True)
    var = jnp.mean((h - mean) ** 2, axis=0, keepdims=True)   # biased (training mode)
    h = (h - mean) * jax.lax.rsqrt(var + _BN_EPS) * gamma + beta
    h = _softplus(_softplus(h))
    return h @ w2 + b2


if __name__ == "__main__":
    input_size = 16
    hidden_sizes = [32, 32]
    output_size = 10

    key = jax.random.PRNGKey(0)
    k_p, k_x1, k_x2 = jax.random.split(key, 3)
    params = make_params(k_p, input_size, hidden_sizes, output_size)

    # case 1: tiny batch (single batch tile)
    x1 = jax.random.normal(k_x1, (8, input_size), jnp.float32)
    theta1 = jax.block_until_ready(categorical_encoder(x1, params))
    ref1 = reference(x1, params)
    assert theta1.shape == (8, output_size)
    assert jnp.allclose(theta1, ref1, atol=1e-4, rtol=1e-4)

    # case 2: batch-tiled path (4 batch tiles) -> BN stats still whole-batch
    x2 = jax.random.normal(k_x2, (256, input_size), jnp.float32)
    theta2 = jax.block_until_ready(categorical_encoder(x2, params, block_rows=64))
    ref2 = reference(x2, params)
    assert theta2.shape == (256, output_size)
    assert jnp.allclose(theta2, ref2, atol=1e-4, rtol=1e-4)

    print("KERNEL_OK")
</pallas_src>

<mosaic_0001>
module attributes {stable_mosaic.version = 11 : i64} {
  func.func @_encoder_kernel(%arg0: i32, %arg1: i32, %arg2: memref<8x16xf32, #tpu.memory_space<vmem>>, %arg3: memref<16x32xf32, #tpu.memory_space<vmem>>, %arg4: memref<1x32xf32, #tpu.memory_space<vmem>>, %arg5: memref<32x32xf32, #tpu.memory_space<vmem>>, %arg6: memref<32x128xf32, #tpu.memory_space<vmem>>, %arg7: memref<1x128xf32, #tpu.memory_space<vmem>>, %arg8: memref<8x128xf32, #tpu.memory_space<vmem>>, %arg9: memref<8x32xf32, #tpu.memory_space<vmem>>, %arg10: memref<1x32xf32, #tpu.memory_space<vmem>>, %arg11: memref<1x32xf32, #tpu.memory_space<vmem>>) attributes {dimension_semantics = [#tpu.dimension_semantics<arbitrary>, #tpu.dimension_semantics<arbitrary>], iteration_bounds = array<i64: 2, 1>, scalar_prefetch = 0 : i64, scratch_operands = 3 : i64, tpu.core_type = #tpu.core_type<tc>, window_params = [{transform_indices = @transform_0, window_bounds = array<i64: 8, 16>}, {pipeline_mode = #tpu.pipeline_mode<synchronous>, transform_indices = @transform_1, window_bounds = array<i64: 16, 32>}, {pipeline_mode = #tpu.pipeline_mode<synchronous>, transform_indices = @transform_2, window_bounds = array<i64: 1, 32>}, {pipeline_mode = #tpu.pipeline_mode<synchronous>, transform_indices = @transform_3, window_bounds = array<i64: 32, 32>}, {pipeline_mode = #tpu.pipeline_mode<synchronous>, transform_indices = @transform_4, window_bounds = array<i64: 32, 128>}, {pipeline_mode = #tpu.pipeline_mode<synchronous>, transform_indices = @transform_5, window_bounds = array<i64: 1, 128>}, {transform_indices = @transform_6, window_bounds = array<i64: 8, 128>}]} {
    %c8_i32 = arith.constant 8 : i32
    %0 = arith.muli %arg1, %c8_i32 : i32
    %1 = tpu.assume_multiple %0, 8 : i32
    %c0_i32 = arith.constant 0 : i32
    %2 = arith.cmpi eq, %arg0, %c0_i32 : i32
    %c0_i32_0 = arith.constant 0 : i32
    %3 = arith.cmpi eq, %arg1, %c0_i32_0 : i32
    %4 = arith.andi %2, %3 : i1
    %5 = arith.extui %4 : i1 to i32
    %c0_i32_1 = arith.constant 0 : i32
    %6 = arith.cmpi ne, %5, %c0_i32_1 : i32
    scf.if %6 {
      %cst = arith.constant 0.000000e+00 : f32
      %13 = vector.broadcast %cst : f32 to vector<1x32xf32>
      %c0 = arith.constant 0 : index
      %c0_5 = arith.constant 0 : index
      %14 = vector.load %arg10[%c0, %c0_5] : memref<1x32xf32, #tpu.memory_space<vmem>>, vector<1x32xf32>
      tpu.vector_store %arg10[%c0, %c0_5], %13 {strides = array<i32>} : memref<1x32xf32, #tpu.memory_space<vmem>>, vector<1x32xf32>,
      %cst_6 = arith.constant 0.000000e+00 : f32
      %15 = vector.broadcast %cst_6 : f32 to vector<1x32xf32>
      %c0_7 = arith.constant 0 : index
      %c0_8 = arith.constant 0 : index
      %16 = vector.load %arg11[%c0_7, %c0_8] : memref<1x32xf32, #tpu.memory_space<vmem>>, vector<1x32xf32>
      tpu.vector_store %arg11[%c0_7, %c0_8], %15 {strides = array<i32>} : memref<1x32xf32, #tpu.memory_space<vmem>>, vector<1x32xf32>,
    } else {
    }
    %c0_i32_2 = arith.constant 0 : i32
    %7 = arith.cmpi eq, %arg0, %c0_i32_2 : i32
    %8 = arith.extui %7 : i1 to i32
    %c0_i32_3 = arith.constant 0 : i32
    %9 = arith.cmpi ne, %8, %c0_i32_3 : i32
    scf.if %9 {
      %c0 = arith.constant 0 : index
      %c0_5 = arith.constant 0 : index
      %13 = vector.load %arg2[%c0, %c0_5] : memref<8x16xf32, #tpu.memory_space<vmem>>, vector<8x16xf32>
      %c0_6 = arith.constant 0 : index
      %c0_7 = arith.constant 0 : index
      %14 = vector.load %arg3[%c0_6, %c0_7] : memref<16x32xf32, #tpu.memory_space<vmem>>, vector<16x32xf32>
      %cst = arith.constant dense<0.000000e+00> : vector<8x32xf32>
      %15 = tpu.matmul %13, %14, %cst {dimension_numbers = #tpu.dot_dimension_numbers<[1], [0], [0], [1], [0, 0, 1, 1], [], []>} : vector<8x16xf32>, vector<16x32xf32>, vector<8x32xf32> -> vector<8x32xf32>
      %c0_8 = arith.constant 0 : index
      %c0_9 = arith.constant 0 : index
      %16 = vector.load %arg4[%c0_8, %c0_9] : memref<1x32xf32, #tpu.memory_space<vmem>>, vector<1x32xf32>
      %17 = vector.broadcast %16 : vector<1x32xf32> to vector<8x32xf32>
      %18 = arith.addf %15, %17 : vector<8x32xf32>
      %cst_10 = arith.constant 0.000000e+00 : f32
      %19 = vector.broadcast %cst_10 : f32 to vector<8x32xf32>
      %20 = arith.maximumf %18, %19 : vector<8x32xf32>
      %21 = math.absf %18 : vector<8x32xf32>
      %cst_11 = arith.constant 0.000000e+00 : f32
      %22 = vector.broadcast %cst_11 : f32 to vector<8x32xf32>
      %23 = arith.subf %22, %21 : vector<8x32xf32>
      %24 = math.exp %23 : vector<8x32xf32>
      %25 = math.log1p %24 : vector<8x32xf32>
      %26 = arith.addf %20, %25 : vector<8x32xf32>
      %c0_12 = arith.constant 0 : index
      %c0_13 = arith.constant 0 : index
      %27 = vector.load %arg5[%c0_12, %c0_13] : memref<32x32xf32, #tpu.memory_space<vmem>>, vector<32x32xf32>
      %cst_14 = arith.constant dense<0.000000e+00> : vector<8x32xf32>
      %28 = tpu.matmul %26, %27, %cst_14 {dimension_numbers = #tpu.dot_dimension_numbers<[1], [0], [0], [1], [0, 0, 1, 1], [], []>} : vector<8x32xf32>, vector<32x32xf32>, vector<8x32xf32> -> vector<8x32xf32>
      %29 = arith.index_cast %1 : i32 to index
      %c0_15 = arith.constant 0 : index
      %30 = vector.load %arg9[%29, %c0_15] : memref<8x32xf32, #tpu.memory_space<vmem>>, vector<8x32xf32>
      tpu.vector_store %arg9[%29, %c0_15], %28 {strides = array<i32>} : memref<8x32xf32, #tpu.memory_space<vmem>>, vector<8x32xf32>,
      %c0_16 = arith.constant 0 : index
      %c0_17 = arith.constant 0 : index
      %31 = vector.load %arg10[%c0_16, %c0_17] : memref<1x32xf32, #tpu.memory_space<vmem>>, vector<1x32xf32>
      %cst_18 = arith.constant dense<0.000000e+00> : vector<32xf32>
      %32 = vector.multi_reduction <add>, %28, %cst_18 [0] : vector<8x32xf32> to vector<32xf32>
      %33 = vector.shape_cast %32 : vector<32xf32> to vector<1x32xf32>
      %34 = arith.addf %31, %33 : vector<1x32xf32>
      %c0_19 = arith.constant 0 : index
      %c0_20 = arith.constant 0 : index
      %35 = vector.load %arg10[%c0_19, %c0_20] : memref<1x32xf32, #tpu.memory_space<vmem>>, vector<1x32xf32>
      tpu.vector_store %arg10[%c0_19, %c0_20], %34 {strides = array<i32>} : memref<1x32xf32, #tpu.memory_space<vmem>>, vector<1x32xf32>,
      %c0_21 = arith.constant 0 : index
      %c0_22 = arith.constant 0 : index
      %36 = vector.load %arg11[%c0_21, %c0_22] : memref<1x32xf32, #tpu.memory_space<vmem>>, vector<1x32xf32>
      %37 = arith.mulf %28, %28 : vector<8x32xf32>
      %cst_23 = arith.constant dense<0.000000e+00> : vector<32xf32>
      %38 = vector.multi_reduction <add>, %37, %cst_23 [0] : vector<8x32xf32> to vector<32xf32>
      %39 = vector.shape_cast %38 : vector<32xf32> to vector<1x32xf32>
      %40 = arith.addf %36, %39 : vector<1x32xf32>
      %c0_24 = arith.constant 0 : index
      %c0_25 = arith.constant 0 : index
      %41 = vector.load %arg11[%c0_24, %c0_25] : memref<1x32xf32, #tpu.memory_space<vmem>>, vector<1x32xf32>
      tpu.vector_store %arg11[%c0_24, %c0_25], %40 {strides = array<i32>} : memref<1x32xf32, #tpu.memory_space<vmem>>, vector<1x32xf32>,
    } else {
    }
    %c1_i32 = arith.constant 1 : i32
    %10 = arith.cmpi eq, %arg0, %c1_i32 : i32
    %11 = arith.extui %10 : i1 to i32
    %c0_i32_4 = arith.constant 0 : i32
    %12 = arith.cmpi ne, %11, %c0_i32_4 : i32
    scf.if %12 {
      %c0 = arith.constant 0 : index
      %c0_5 = arith.constant 0 : index
      %13 = vector.load %arg10[%c0, %c0_5] : memref<1x32xf32, #tpu.memory_space<vmem>>, vector<1x32xf32>
      %cst = arith.constant 1.250000e-01 : f32
      %14 = vector.broadcast %cst : f32 to vector<1x32xf32>
      %15 = arith.mulf %13, %14 : vector<1x32xf32>
      %c0_6 = arith.constant 0 : index
      %c0_7 = arith.constant 0 : index
      %16 = vector.load %arg11[%c0_6, %c0_7] : memref<1x32xf32, #tpu.memory_space<vmem>>, vector<1x32xf32>
      %cst_8 = arith.constant 1.250000e-01 : f32
      %17 = vector.broadcast %cst_8 : f32 to vector<1x32xf32>
      %18 = arith.mulf %16, %17 : vector<1x32xf32>
      %19 = arith.mulf %15, %15 : vector<1x32xf32>
      %20 = arith.subf %18, %19 : vector<1x32xf32>
      %cst_9 = arith.constant 9.99999974E-6 : f32
      %21 = vector.broadcast %cst_9 : f32 to vector<1x32xf32>
      %22 = arith.addf %20, %21 : vector<1x32xf32>
      %23 = math.rsqrt %22 : vector<1x32xf32>
      %24 = arith.index_cast %1 : i32 to index
      %c0_10 = arith.constant 0 : index
      %25 = vector.load %arg9[%24, %c0_10] : memref<8x32xf32, #tpu.memory_space<vmem>>, vector<8x32xf32>
      %26 = vector.broadcast %15 : vector<1x32xf32> to vector<8x32xf32>
      %27 = arith.subf %25, %26 : vector<8x32xf32>
      %28 = vector.broadcast %23 : vector<1x32xf32> to vector<8x32xf32>
      %29 = arith.mulf %27, %28 : vector<8x32xf32>
      %cst_11 = arith.constant 0.000000e+00 : f32
      %30 = vector.broadcast %cst_11 : f32 to vector<8x32xf32>
      %31 = arith.maximumf %29, %30 : vector<8x32xf32>
      %32 = math.absf %29 : vector<8x32xf32>
      %cst_12 = arith.constant 0.000000e+00 : f32
      %33 = vector.broadcast %cst_12 : f32 to vector<8x32xf32>
      %34 = arith.subf %33, %32 : vector<8x32xf32>
      %35 = math.exp %34 : vector<8x32xf32>
      %36 = math.log1p %35 : vector<8x32xf32>
      %37 = arith.addf %31, %36 : vector<8x32xf32>
      %cst_13 = arith.constant 0.000000e+00 : f32
      %38 = vector.broadcast %cst_13 : f32 to vector<8x32xf32>
      %39 = arith.maximumf %37, %38 : vector<8x32xf32>
      %40 = math.absf %37 : vector<8x32xf32>
      %cst_14 = arith.constant 0.000000e+00 : f32
      %41 = vector.broadcast %cst_14 : f32 to vector<8x32xf32>
      %42 = arith.subf %41, %40 : vector<8x32xf32>
      %43 = math.exp %42 : vector<8x32xf32>
      %44 = math.log1p %43 : vector<8x32xf32>
      %45 = arith.addf %39, %44 : vector<8x32xf32>
      %c0_15 = arith.constant 0 : index
      %c0_16 = arith.constant 0 : index
      %46 = vector.load %arg6[%c0_15, %c0_16] : memref<32x128xf32, #tpu.memory_space<vmem>>, vector<32x128xf32>
      %cst_17 = arith.constant dense<0.000000e+00> : vector<8x128xf32>
      %47 = tpu.matmul %45, %46, %cst_17 {dimension_numbers = #tpu.dot_dimension_numbers<[1], [0], [0], [1], [0, 0, 1, 1], [], []>} : vector<8x32xf32>, vector<32x128xf32>, vector<8x128xf32> -> vector<8x128xf32>
      %c0_18 = arith.constant 0 : index
      %c0_19 = arith.constant 0 : index
      %48 = vector.load %arg7[%c0_18, %c0_19] : memref<1x128xf32, #tpu.memory_space<vmem>>, vector<1x128xf32>
      %49 = vector.broadcast %48 : vector<1x128xf32> to vector<8x128xf32>
      %50 = arith.addf %47, %49 : vector<8x128xf32>
      %c0_20 = arith.constant 0 : index
      %c0_21 = arith.constant 0 : index
      %51 = vector.load %arg8[%c0_20, %c0_21] : memref<8x128xf32, #tpu.memory_space<vmem>>, vector<8x128xf32>
      tpu.vector_store %arg8[%c0_20, %c0_21], %50 {strides = array<i32>} : memref<8x128xf32, #tpu.memory_space<vmem>>, vector<8x128xf32>,
    } else {
    }
    return
  }
  func.func @transform_0(%arg0: i32, %arg1: i32) -> (i32, i32) {
    %c0_i32 = arith.constant 0 : i32
    %c0_i32_0 = arith.constant 0 : i32
    return %arg1, %c0_i32 : i32, i32
  }
  func.func @transform_1(%arg0: i32, %arg1: i32) -> (i32, i32) {
    %c0_i32 = arith.constant 0 : i32
    %c0_i32_0 = arith.constant 0 : i32
    %c0_i32_1 = arith.constant 0 : i32
    return %c0_i32, %c0_i32_0 : i32, i32
  }
  func.func @transform_2(%arg0: i32, %arg1: i32) -> (i32, i32) {
    %c0_i32 = arith.constant 0 : i32
    %c0_i32_0 = arith.constant 0 : i32
    %c0_i32_1 = arith.constant 0 : i32
    return %c0_i32, %c0_i32_0 : i32, i32
  }
  func.func @transform_3(%arg0: i32, %arg1: i32) -> (i32, i32) {
    %c0_i32 = arith.constant 0 : i32
    %c0_i32_0 = arith.constant 0 : i32
    %c0_i32_1 = arith.constant 0 : i32
    return %c0_i32, %c0_i32_0 : i32, i32
  }
  func.func @transform_4(%arg0: i32, %arg1: i32) -> (i32, i32) {
    %c0_i32 = arith.constant 0 : i32
    %c0_i32_0 = arith.constant 0 : i32
    %c0_i32_1 = arith.constant 0 : i32
    return %c0_i32, %c0_i32_0 : i32, i32
  }
  func.func @transform_5(%arg0: i32, %arg1: i32) -> (i32, i32) {
    %c0_i32 = arith.constant 0 : i32
    %c0_i32_0 = arith.constant 0 : i32
    %c0_i32_1 = arith.constant 0 : i32
    return %c0_i32, %c0_i32_0 : i32, i32
  }
  func.func @transform_6(%arg0: i32, %arg1: i32) -> (i32, i32) {
    %c0_i32 = arith.constant 0 : i32
    %c0_i32_0 = arith.constant 0 : i32
    return %arg1, %c0_i32 : i32, i32
  }
}

</mosaic_0001>

<bundles_post_ra>
// kernel: tpu_custom_call.1
= control target key start
LH: loop header
LB: loop body
LE: loop exit
PB: predicated region body
PF: predicated region fallthrough
CT: control target
= control target key end

     0   :  { %11 = vsyncpa [#allocation6], 0  ;;  %s1048_s0 = inlined_call_operand.hbm [shape: f32[8,16], index: 0, kind: input, shape index: {}]   ;;  %s1049_s1 = inlined_call_operand.hbm [shape: f32[16,32], index: 1, kind: input, shape index: {}]   ;;  %s1050_s2 = inlined_call_operand.vmem [shape: f32[1,32], index: 2, kind: input, shape index: {}]   ;;  %s1051_s3 = inlined_call_operand.hbm [shape: f32[32,32], index: 3, kind: input, shape index: {}]   ;;  %s1052_s4 = inlined_call_operand.hbm [shape: f32[32,128], index: 4, kind: input, shape index: {}]   ;;  %s1053_s5 = inlined_call_operand.vmem [shape: f32[1,128], index: 5, kind: input, shape index: {}]   ;;  %s1054_s6 = inlined_call_operand.hbm [shape: f32[8,128], index: 6, kind: output, shape index: {}]  }
   0x1   :  { %12 = vsyncpa [#allocation9], 0 }
   0x2   :  { %13 = vsyncpa [#allocation12], 0 }
   0x3   :  { %14 = vsyncpa [#allocation7], 0  ;;  %s952_s21 = smov 0   ;;  %s954_s22 = smov 0  }
   0x4   :  { %s956_s23 = smov 0  }
   0x5 LB: > { %s219_s26 = sshll.u32 %s1049_s1, 4  ;;  %s608_s27 = sadd.s32 4294967295, %s907_s23   ;;  %s907_s23 = sphi %s956_s23, %s20_s23   ;;  %s903_s22 = sphi %s954_s22, %s1059_s22   ;;  %s899_s21 = sphi %s952_s21, %s1058_s21   ;;  %s220_s26 = int_to_ptr.hbm [resolvable:$true] %s219_s26 }
   0x6   : > { %p609_p0 = scmp.ge.s32.totalorder %s907_s23, 1  ;;  %p194_p1 = scmp.lt.s32.totalorder %s907_s23, 3 }
   0x7   : > { %p975_p2 = scmp.eq.s32.totalorder %s608_s27, 0  ;;  %s909_s30 = smov [#allocation8]  }
   0x8   : > { %p979_p3 = pnand %p609_p0, %p194_p1  ;;  %s221_s7 = sshll.u32 %s909_s30, 4  ;;  %s222_s7 = int_to_ptr.vmem [resolvable:$true] %s221_s7 }
   0x9   : > { %s32_s9 = sadd.s32 1, %s903_s22  ;;  %s910_s10 = smov 128  }
   0xa   : > { %p650_p4 = pneg %p979_p3  ;;  %p34_p6 = scmp.ge.s32.totalorder %s32_s9, 2 }
   0xb   : > { %s911_s11 = smov 8   ;;  %s208_s14 = sshll.u32 %s1048_s0, 4  ;;  %s209_s14 = int_to_ptr.hbm [resolvable:$true] %s208_s14 }
   0xc   : > { %p987_p5 = pnand %p975_p2, %p650_p4  ;;  %s1061_s9 = smov (%p34_p6, %s32_s9), 0 }
   0xd   : > { %s912_s15 = smov [#allocation5]   ;;  %s236_s19 = sshll.u32 %s1051_s3, 4  ;;  %s237_s19 = int_to_ptr.hbm [resolvable:$true] %s236_s19 }
   0xe   : > { %656 = dma.hbm_to_vmem [thread:$0]  (!%p987_p5), %s220_s26, 256, %s222_s7, [#allocation9], %s910_s10, %s910_s10, %s911_s11  }
   0xf   : > { %s210_s16 = sshll.u32 %s912_s15, 4  ;;  %s913_s20 = smov [#allocation10]   ;;  %s211_s16 = int_to_ptr.vmem [resolvable:$true] %s210_s16 }
  0x10   : > { %653 = dma.hbm_to_vmem [thread:$0]  (!%p987_p5), %s209_s14, 128, %s211_s16, [#allocation6]  }
  0x11   : > { %s238_s24 = sshll.u32 %s913_s20, 4  ;;  %s250_s30 = sshll.u32 %s1052_s4, 4  ;;  %s239_s24 = int_to_ptr.vmem [resolvable:$true] %s238_s24  ;;  %s251_s30 = int_to_ptr.hbm [resolvable:$true] %s250_s30 }
  0x12   : > { %659 = dma.hbm_to_vmem [thread:$0]  (!%p987_p5), %s237_s19, 512, %s239_s24, [#allocation9], %s910_s10, %s910_s10, %s911_s11  }
  0x13   : > { %s914_s7 = smov [#allocation11]   ;;  %271 = sbr.rel (%p979_p3) target bundleno = 573 (0x23d), region = 44 }
  0x14   : > { %s252_s12 = sshll.u32 %s914_s7, 4  ;;  %s253_s12 = int_to_ptr.vmem [resolvable:$true] %s252_s12 }
  0x15   : > { %662 = dma.hbm_to_vmem [thread:$0]  (!%p987_p5), %s251_s30, 512, %s253_s12, [#allocation12], %s910_s10, %s910_s10, %s911_s11  }
  0x18   : > { %882 = dma.done.wait (%p975_p2), [#allocation6], 128  }
  0x19   : > { %884 = vsyncadd (%p975_p2), [#allocation6], 4294967168 }
  0x1a   : > { %886 = dma.done.wait (%p975_p2), [#allocation9], 768  }
  0x1b   : > { %888 = vsyncadd (%p975_p2), [#allocation9], 4294966528 }
  0x1c   : > { %890 = dma.done.wait (%p975_p2), [#allocation12], 512  }
  0x1d   : > { %892 = vsyncadd (%p975_p2), [#allocation12], 4294966784  ;;  %p308_p7 = scmp.eq.s32.totalorder %s899_s21, 0 }
  0x1e   : > { %vm314_vm0 = vcmask (%p308_p7), 253952   ;;  %v915_v0 = vmov (%p308_p7), 0.0  }
  0x1f   : > { %313 = sbr.rel (!%p308_p7) target bundleno = 36 (0x24), region = 64  ;;  %315 = vst.msk [vmem:[#allocation3] sm:$0x1] (%p308_p7), %vm314_vm0, %v915_v0 }
  0x20   : > { %316 = vst.msk [vmem:[#allocation4] sm:$0x1] (%p308_p7), %vm314_vm0, %v915_v0 }
  0x24 PF: > { %p620_p8 = scmp.ne.s32.totalorder %s899_s21, 0 }
  0x26   : > { %319 = sbr.rel (%p620_p8) target bundleno = 346 (0x15a), region = 68 }
  0x2b   : > { %v322_v1 = vld [vmem:[#allocation8 + $0x8] sm:$0xff]  ;;  %v321_v2 = vld [vmem:[#allocation8] sm:$0xff]  ;;  %v320_v3 = vld [vmem:[#allocation5] sm:$0xff]  ;;  %vm327_vm1 = vcmask 130048   ;;  %vm370_vm3 = vcmask 261120   ;;  %vm405_vm4 = vcmask 253952  }
  0x2c   : > { %345 = vmatpush.msra.mxu0 %v322_v1  ;;  %v369_v4 = vld [vmem:[#allocation10 + $0x18] sm:$0xff]  ;;  %v368_v5 = vld [vmem:[#allocation10 + $0x10] sm:$0xff]  ;;  %v367_v6 = vld [vmem:[#allocation10 + $0x8] sm:$0xff] }
  0x2d   : > { %386 = vmatpush.msra.mxu1 %v369_v4  ;;  %v366_v7 = vld [vmem:[#allocation10] sm:$0xff]  ;;  %v705_v8 = vld [vmem:[%s1050_s2] ss:$0 sm:$0xff] }
  0x2e   : > { %346 = vmatpush.msra.mxu0 %v321_v2  ;;  %v396_v38 = vld [vmem:[#allocation3] sm:$0x1]  ;;  %v407_v41 = vld [vmem:[#allocation4] sm:$0x1] }
  0x2f   : > { %621 = vmatmul.msk.f32.vlgmr.msra.gmra.mxu0 %vm327_vm1, %v320_v3  ;;  %387 = vmatpush.msra.mxu1 %v368_v5 }
  0x31   : > { %388 = vmatpush.msra.mxu1 %v367_v6 }
  0x33   : > { %389 = vmatpush.msra.mxu1 %v366_v7 }
  0xac   : > { %v348_v9 = vpop.f32.mrf.mxu0 }
  0xad   : > { %v349_v10 = vadd.f32 %v705_v8, %v348_v9 }
  0xaf   : > { %v352_v11 = vand.u32 2147483647, %v349_v10  ;;  %v351_v22 = vmax.f32 %v349_v10, 0.0 }
  0xb1   : > { %v353_v12 = vsub.f32 0.0, %v352_v11 }
  0xb3   : > { %v354_v13 = vmul.f32 1.442695, %v353_v12 }
  0xb5   : > { %706 = vpow2.f32 %v354_v13 }
  0xbb   : > { %v707_v14 = vpop.eup %706 }
  0xbc   : > { %v356_v15 = vadd.f32 1.0, %v707_v14  ;;  %v359_v16 = vmul.f32 -0.5, %v707_v14  ;;  %v362_v18 = vand.u32 2147483647, %v707_v14 }
  0xbe   : > { %708 = vlog2.f32 %v356_v15  ;;  %v360_v17 = vadd.f32 1.0, %v359_v16  ;;  %vm363_vm2 = vcmp.lt.f32.partialorder %v362_v18, 0.0004427343 }
  0xc0   : > { %v361_v21 = vmul.f32 %v707_v14, %v360_v17 }
  0xc4   : > { %v709_v19 = vpop.eup %708 }
  0xc5   : > { %v358_v20 = vmul.f32 0.6931472, %v709_v19 }
  0xc7   : > { %v364_v23 = vsel %vm363_vm2, %v361_v21, %v358_v20 }
  0xc8   : > { %v365_v24 = vadd.f32 %v364_v23, %v351_v22 }
  0xca   : > { %622 = vmatmul.msk.f32.vlgmr.msra.gmra.mxu1 %vm370_vm3, %v365_v24 }
 0x147   : > { %v391_v25 = vpop.f32.mrf.mxu1 }
 0x148   : > { %395 = vst.msk [vmem:[#allocation2] sm:$0xff] %vm370_vm3, %v391_v25  ;;  %v397_v26 = vsel %vm370_vm3, %v391_v25, 0.0  ;;  %v408_v27 = vmul.f32 %v391_v25, %v391_v25 }
 0x149   : > { %v398_v28 = vrot.slane %v397_v26, 4 }
 0x14a   : > { %v409_v29 = vsel %vm370_vm3, %v408_v27, 0.0 }
 0x14b   : > { %v399_v30 = vadd.f32 %v398_v28, %v397_v26  ;;  %v410_v31 = vrot.slane %v409_v29, 4 }
 0x14d   : > { %v400_v32 = vrot.slane %v399_v30, 2  ;;  %v411_v33 = vadd.f32 %v410_v31, %v409_v29 }
 0x14f   : > { %v401_v34 = vadd.f32 %v400_v32, %v399_v30  ;;  %v412_v35 = vrot.slane %v411_v33, 2 }
 0x151   : > { %v402_v36 = vrot.slane %v401_v34, 1  ;;  %v413_v37 = vadd.f32 %v412_v35, %v411_v33 }
 0x153   : > { %v403_v39 = vadd.f32 %v402_v36, %v401_v34  ;;  %v414_v40 = vrot.slane %v413_v37, 1 }
 0x155   : > { %v404_v42 = vadd.f32 %v403_v39, %v396_v38  ;;  %v415_v43 = vadd.f32 %v414_v40, %v413_v37 }
 0x157   : > { %406 = vst.msk [vmem:[#allocation3] sm:$0x1] %vm405_vm4, %v404_v42  ;;  %v416_v44 = vadd.f32 %v415_v43, %v407_v41 }
 0x159   : > { %417 = vst.msk [vmem:[#allocation4] sm:$0x1] %vm405_vm4, %v416_v44 }
 0x15a PF: > { %p623_p9 = scmp.ne.s32.totalorder %s899_s21, 1 }
 0x15c   : > { %421 = sbr.rel (%p623_p9) target bundleno = 567 (0x237), region = 72 }
 0x161   : > { %v482_v45 = vld [vmem:[#allocation11 + $0x18] sm:$0xff]  ;;  %v481_v46 = vld [vmem:[#allocation11 + $0x10] sm:$0xff]  ;;  %v422_v47 = vld [vmem:[#allocation3] sm:$0x1]  ;;  %vm487_vm10 = vcmask 261120  }
 0x162   : > { %503 = vmatpush.msra.mxu0 %v482_v45  ;;  %v424_v48 = vld [vmem:[#allocation4] sm:$0x1]  ;;  %v480_v49 = vld [vmem:[#allocation11 + $0x8] sm:$0xff]  ;;  %v423_v50 = vmul.f32 0.125, %v422_v47  ;;  %v440_v62 = vld [vmem:[#allocation2] sm:$0xff] }
 0x163   : > { %v425_v51 = vmul.f32 0.125, %v424_v48  ;;  %v479_v52 = vld [vmem:[#allocation11] sm:$0xff]  ;;  %v710_v32 = vld [vmem:[%s1053_s5] ss:$0 sm:$0xff] }
 0x164   : > { %504 = vmatpush.msra.mxu0 %v481_v46  ;;  %v426_v53 = vmul.f32 %v423_v50, %v423_v50  ;;  %v442_v60 = vperm.slane %v423_v50, 0 }
 0x166   : > { %505 = vmatpush.msra.mxu0 %v480_v49  ;;  %v427_v54 = vsub.f32 %v425_v51, %v426_v53  ;;  %v444_v0 = vsub.f32 %v440_v62, %v442_v60 }
 0x168   : > { %506 = vmatpush.msra.mxu0 %v479_v52  ;;  %v428_v55 = vadd.f32 1e-05, %v427_v54 }
 0x16a   : > { %711 = vrsqrt.f32 %v428_v55  ;;  %vm435_vm5 = vweird.f32 %v428_v55 }
 0x170   : > { %v712_v56 = vpop.eup %711 }
 0x171   : > { %v430_v57 = vmul.f32 %v712_v56, %v428_v55  ;;  %vm436_vm6 = vweird.f32 %v712_v56 }
 0x172   : > { %vm437_vm7 = vmor %vm435_vm5, %vm436_vm6 }
 0x173   : > { %v431_v58 = vmul.f32 %v712_v56, %v430_v57 }
 0x175   : > { %v432_v59 = vmul.f32 0.5, %v431_v58 }
 0x177   : > { %v433_v61 = vsub.f32 1.5, %v432_v59 }
 0x179   : > { %v434_v63 = vmul.f32 %v712_v56, %v433_v61 }
 0x17b   : > { %v438_v1 = vsel %vm437_vm7, %v712_v56, %v434_v63 }
 0x17c   : > { %v446_v2 = vperm.slane %v438_v1, 0 }
 0x17e   : > { %v448_v3 = vmul.f32 %v446_v2, %v444_v0 }
 0x180   : > { %v450_v4 = vand.u32 2147483647, %v448_v3  ;;  %v449_v14 = vmax.f32 %v448_v3, 0.0 }
 0x182   : > { %v451_v5 = vsub.f32 0.0, %v450_v4 }
 0x184   : > { %v452_v6 = vmul.f32 1.442695, %v451_v5 }
 0x186   : > { %713 = vpow2.f32 %v452_v6 }
 0x18c   : > { %v714_v7 = vpop.eup %713 }
 0x18d   : > { %v454_v8 = vadd.f32 1.0, %v714_v7  ;;  %v457_v9 = vmul.f32 -0.5, %v714_v7  ;;  %v460_v11 = vand.u32 2147483647, %v714_v7 }
 0x18f   : > { %715 = vlog2.f32 %v454_v8  ;;  %v458_v10 = vadd.f32 1.0, %v457_v9  ;;  %vm461_vm8 = vcmp.lt.f32.partialorder %v460_v11, 0.0004427343 }
 0x191   : > { %v459_v12 = vmul.f32 %v714_v7, %v458_v10 }
 0x195   : > { %v716_v13 = vpop.eup %715 }
 0x196   : > { %v456_v15 = vmul.f32 0.6931472, %v716_v13 }
 0x198   : > { %v462_v16 = vsel %vm461_vm8, %v459_v12, %v456_v15 }
 0x199   : > { %v463_v17 = vadd.f32 %v462_v16, %v449_v14 }
 0x19b   : > { %v465_v18 = vand.u32 2147483647, %v463_v17  ;;  %v464_v28 = vmax.f32 %v463_v17, 0.0 }
 0x19d   : > { %v466_v19 = vsub.f32 0.0, %v465_v18 }
 0x19f   : > { %v467_v20 = vmul.f32 1.442695, %v466_v19 }
 0x1a1   : > { %717 = vpow2.f32 %v467_v20 }
 0x1a7   : > { %v718_v21 = vpop.eup %717 }
 0x1a8   : > { %v469_v22 = vadd.f32 1.0, %v718_v21  ;;  %v472_v23 = vmul.f32 -0.5, %v718_v21  ;;  %v475_v25 = vand.u32 2147483647, %v718_v21 }
 0x1aa   : > { %719 = vlog2.f32 %v469_v22  ;;  %v473_v24 = vadd.f32 1.0, %v472_v23  ;;  %vm476_vm9 = vcmp.lt.f32.partialorder %v475_v25, 0.0004427343 }
 0x1ac   : > { %v474_v26 = vmul.f32 %v718_v21, %v473_v24 }
 0x1b0   : > { %v720_v27 = vpop.eup %719 }
 0x1b1   : > { %v471_v29 = vmul.f32 0.6931472, %v720_v27 }
 0x1b3   : > { %v477_v30 = vsel %vm476_vm9, %v474_v26, %v471_v29 }
 0x1b4   : > { %v478_v31 = vadd.f32 %v477_v30, %v464_v28 }
 0x1b6   : > { %624 = vmatmul.msk.f32.vlgmr.msra.gmra.mxu0 %vm487_vm10, %v478_v31 }
 0x233   : > { %v508_v33 = vpop.f32.mrf.mxu0 }
 0x234   : > { %v509_v34 = vadd.f32 %v710_v32, %v508_v33 }
 0x236   : > { %511 = vst [vmem:[#allocation13] sm:$0xff] %v509_v34 }
 0x237 PF: > { %p671_p10 = scmp.eq.s32.totalorder %s608_s27, 1  ;;  %s522_s13 = sshll.u32 %s1054_s6, 4  ;;  %s523_s13 = int_to_ptr.hbm [resolvable:$true] %s522_s13 }
 0x238   : > { %s916_s14 = smov [#allocation13]  }
 0x239   : > { %s520_s15 = sshll.u32 %s916_s14, 4  ;;  %s521_s15 = int_to_ptr.vmem [resolvable:$true] %s520_s15 }
 0x23a   : > { %647 = dma.vmem_to_hbm [thread:$0]  (%p671_p10), %s521_s15, 128, %s523_s13, [#allocation7]  }
 0x23b   : > { %894 = dma.done.wait (%p671_p10), [#allocation7], 128  }
 0x23c   : > { %896 = vsyncadd (%p671_p10), [#allocation7], 4294967168 }
 0x23d PF: > { %s20_s23 = sadd.s32 1, %s907_s23   ;;  %s1058_s21 = smov %s903_s22 }
 0x23e   : > { %p17_p11 = scmp.ge.s32.totalorder %s20_s23, 4   ;;  %s1059_s22 = smov %s1061_s9 }
 0x240   :  { %19 = sbr.rel (!%p17_p11) target bundleno = 5 (0x5), region = 101 }
 0x245   :  { %536 = vsyncpa [#allocation6], 1 }
 0x246   :  { %538 = vsyncpa [#allocation6 + $0x1], 1 }
 0x247   :  { %539 = vsyncpa [#allocation9], 1 }
 0x248   :  { %540 = vsyncpa [#allocation12], 1 }
 0x249   :  { %541 = vsyncpa [#allocation7], 1 }
 0x24a   :  { %543 = vsyncpa [#allocation7 + $0x1], 1 }

</bundles_post_ra>
